<compile_context>
chip_gen: v7x
topology: tpu7x:2x2x1
jax: 0.10.0
libtpu: 0.0.40
codegen_flags: <defaults>
</compile_context>

<pallas_src>
import jax
import jax.numpy as jnp
from jax.experimental import pallas as pl
from jax.experimental.pallas import tpu as pltpu


def _token_kernel(idx_ref, tok_ref, o_ref):
    # idx_ref: (tr, pack) int32 class ids
    # tok_ref: (c_in, pack*h) table, each row pre-tiled `pack` times
    # o_ref:   (tr, pack*h)
    idx = idx_ref[...]
    tr, pack = idx.shape
    c_in, hw = tok_ref.shape
    h = hw // pack

    # Per-lane class id.  Lane j belongs to packed slot j // h; instead of a
    # division + equality select-chain, use monotone `lane >= s*h` compares
    # (1 iota + (pack-1) cmp/sel per vreg).  For pack == 1 no lane work at all.
    if pack > 1:
        lane = jax.lax.broadcasted_iota(jnp.int32, (tr, hw), 1)
        idx_lane = idx[:, 0:1]
        for s in range(1, pack):
            idx_lane = jnp.where(lane >= s * h, idx[:, s:s + 1], idx_lane)
    else:
        idx_lane = idx[:, 0:1]

    # Select-chain gather over the tiny table.  Table rows are kept as (1, hw)
    # operands (replicated-sublane layout) rather than explicit broadcast_to,
    # so no VALU broadcast chain.  Row 0 is the default -> OOB / negative ids
    # (and any ragged-block garbage) fall back to row 0.
    # TODO(synk): for c_in > ~16 switch to a one-hot MXU matmul (or sublane
    # gather) path; the linear where-chain would saturate the 4 VALU slots.
    out = tok_ref[0:1, :]
    for c in range(1, c_in):
        out = jnp.where(idx_lane == c, tok_ref[c:c + 1, :], out)

    o_ref[...] = jnp.broadcast_to(out, o_ref.shape).astype(o_ref.dtype)


def token_forward(x, token, *, tile_rows=4096):
    """x: integer array of any shape; token: (c_in, h) float table."""
    c_in, h = token.shape
    orig_shape = x.shape
    idx = x.astype(jnp.int32).reshape(-1)     # (N,) -- int64 inputs truncate
    n = idx.shape[0]
    if n == 0:
        return jnp.zeros((*orig_shape, h), dtype=token.dtype)

    # Lane-dense packing: put `pack` tokens side-by-side so the output's last
    # dim is a multiple of 128 lanes (unmasked vst instead of vst.msk).
    pack = 128 // h if (h < 128 and 128 % h == 0) else 1
    hw = pack * h
    rows = pl.cdiv(n, pack)

    # Pad indices only up to the next multiple of `pack` (<= pack-1 tokens);
    # padded slots hit (valid) table row 0 and are sliced off afterwards.
    n_pack = rows * pack
    if n_pack != n:
        idx = jnp.pad(idx, (0, n_pack - n))
    idx2 = idx.reshape(rows, pack)

    # Pre-tile each table row `pack` times along lanes (few hundred bytes,
    # fuses under jit).
    tok_wide = jnp.tile(token, (1, pack)) if pack > 1 else token

    # Sublane granularity of the output block depends on dtype packing
    # (f32 -> 8, bf16 -> 16, int8/fp8 -> 32).
    sub = {4: 8, 2: 16, 1: 32}.get(jnp.dtype(token.dtype).itemsize, 8)

    # Tile choice: as large as tile_rows (VMEM is never the constraint: the
    # double-buffered working set is only a few MiB), but keep ~8+ grid steps
    # for large inputs so both v7x TensorCores stay pipelined, and prefer an
    # even step count so the two cores are balanced.
    tr = min(tile_rows, pl.cdiv(rows, 8))
    tr = max(sub, pl.cdiv(tr, sub) * sub)
    steps = pl.cdiv(rows, tr)
    if steps > 1 and steps % 2 == 1:
        tr = max(sub, pl.cdiv(pl.cdiv(rows, steps + 1), sub) * sub)
        steps = pl.cdiv(rows, tr)

    out = pl.pallas_call(
        _token_kernel,
        out_shape=jax.ShapeDtypeStruct((rows, hw), token.dtype),
        grid_spec=pltpu.PrefetchScalarGridSpec(
            num_scalar_prefetch=0,
            grid=(steps,),
            in_specs=[
                # index tile (tiny; its DMA hides under the output writeback)
                pl.BlockSpec((tr, pack), lambda i: (i, 0)),
                # full (tiny) table, resident across the whole grid
                pl.BlockSpec((c_in, hw), lambda i: (0, 0)),
            ],
            out_specs=pl.BlockSpec((tr, hw), lambda i: (i, 0)),
        ),
        compiler_params=pltpu.CompilerParams(
            dimension_semantics=("parallel",)),
    )(idx2, tok_wide)

    # (rows, pack*h) -> (rows*pack, h) is a free row-major reshape; a copying
    # slice only happens for the <= pack-1 token remainder.
    out = out.reshape(n_pack, h)
    if n_pack != n:
        out = out[:n]
    return out.reshape(*orig_shape, h)


if __name__ == "__main__":
    key = jax.random.PRNGKey(0)
    k_tok, k_x = jax.random.split(key)

    c_in, h = 2, 64
    # deterministic "trainable token" parameter, shape (c_in, h) like torch.randn(c_in, h)
    token = jax.random.normal(k_tok, (c_in, h), dtype=jnp.float32)

    # integer input x: a small batch of discrete maps, (B, H, W)
    x = jax.random.randint(k_x, (2, 16, 16), 0, c_in, dtype=jnp.int32)

    fwd = jax.jit(token_forward)
    y = jax.block_until_ready(fwd(x, token))

    # reference check: plain JAX embedding lookup (select-gather is bit-exact)
    y_ref = token[x]
    assert y.shape == (2, 16, 16, h), y.shape
    assert jnp.array_equal(y, y_ref), "mismatch vs reference lookup"

    print("KERNEL_OK")
</pallas_src>

<mosaic_0001>
module attributes {stable_mosaic.version = 11 : i64} {
  func.func @_token_kernel(%arg0: i32, %arg1: memref<32x2xi32, #tpu.memory_space<vmem>>, %arg2: memref<2x128xf32, #tpu.memory_space<vmem>>, %arg3: memref<32x128xf32, #tpu.memory_space<vmem>>) attributes {dimension_semantics = [#tpu.dimension_semantics<parallel>], iteration_bounds = array<i64: 8>, scalar_prefetch = 0 : i64, scratch_operands = 0 : i64, tpu.core_type = #tpu.core_type<tc>, window_params = [{transform_indices = @transform_0, window_bounds = array<i64: 32, 2>}, {pipeline_mode = #tpu.pipeline_mode<synchronous>, transform_indices = @transform_1, window_bounds = array<i64: 2, 128>}, {transform_indices = @transform_2, window_bounds = array<i64: 32, 128>}]} {
    %c0 = arith.constant 0 : index
    %c0_0 = arith.constant 0 : index
    %0 = vector.load %arg1[%c0, %c0_0] : memref<32x2xi32, #tpu.memory_space<vmem>>, vector<32x2xi32>
    %1 = tpu.iota {dimensions = array<i32: 1>} : vector<32x128xi32>
    %2 = vector.extract_strided_slice %0 {offsets = [0, 0], sizes = [32, 1], strides = [1, 1]} : vector<32x2xi32> to vector<32x1xi32>
    %c64_i32 = arith.constant 64 : i32
    %3 = vector.broadcast %c64_i32 : i32 to vector<32x128xi32>
    %4 = arith.cmpi sge, %1, %3 : vector<32x128xi32>
    %5 = vector.extract_strided_slice %0 {offsets = [0, 1], sizes = [32, 1], strides = [1, 1]} : vector<32x2xi32> to vector<32x1xi32>
    %6 = vector.shape_cast %5 : vector<32x1xi32> to vector<32x1xi32>
    %7 = vector.broadcast %6 : vector<32x1xi32> to vector<32x128xi32>
    %8 = vector.shape_cast %2 : vector<32x1xi32> to vector<32x1xi32>
    %9 = vector.broadcast %8 : vector<32x1xi32> to vector<32x128xi32>
    %10 = arith.select %4, %7, %9 : vector<32x128xi1>, vector<32x128xi32>
    %c0_1 = arith.constant 0 : index
    %c0_2 = arith.constant 0 : index
    %11 = vector.load %arg2[%c0_1, %c0_2] : memref<2x128xf32, #tpu.memory_space<vmem>>, vector<1x128xf32>
    %c1_i32 = arith.constant 1 : i32
    %12 = vector.broadcast %c1_i32 : i32 to vector<32x128xi32>
    %13 = arith.cmpi eq, %10, %12 : vector<32x128xi32>
    %c1 = arith.constant 1 : index
    %c0_3 = arith.constant 0 : index
    %14 = vector.load %arg2[%c1, %c0_3] : memref<2x128xf32, #tpu.memory_space<vmem>>, vector<1x128xf32>
    %15 = vector.shape_cast %14 : vector<1x128xf32> to vector<1x128xf32>
    %16 = vector.broadcast %15 : vector<1x128xf32> to vector<32x128xf32>
    %17 = vector.shape_cast %11 : vector<1x128xf32> to vector<1x128xf32>
    %18 = vector.broadcast %17 : vector<1x128xf32> to vector<32x128xf32>
    %19 = arith.select %13, %16, %18 : vector<32x128xi1>, vector<32x128xf32>
    %c0_4 = arith.constant 0 : index
    %c0_5 = arith.constant 0 : index
    %20 = vector.load %arg3[%c0_4, %c0_5] : memref<32x128xf32, #tpu.memory_space<vmem>>, vector<32x128xf32>
    tpu.vector_store %arg3[%c0_4, %c0_5], %19 {strides = array<i32>} : memref<32x128xf32, #tpu.memory_space<vmem>>, vector<32x128xf32>,
    return
  }
  func.func @transform_0(%arg0: i32) -> (i32, i32) {
    %c0_i32 = arith.constant 0 : i32
    %c0_i32_0 = arith.constant 0 : i32
    return %arg0, %c0_i32 : i32, i32
  }
  func.func @transform_1(%arg0: i32) -> (i32, i32) {
    %c0_i32 = arith.constant 0 : i32
    %c0_i32_0 = arith.constant 0 : i32
    %c0_i32_1 = arith.constant 0 : i32
    return %c0_i32, %c0_i32_0 : i32, i32
  }
  func.func @transform_2(%arg0: i32) -> (i32, i32) {
    %c0_i32 = arith.constant 0 : i32
    %c0_i32_0 = arith.constant 0 : i32
    return %arg0, %c0_i32 : i32, i32
  }
}

</mosaic_0001>

<bundles_post_ra>
// kernel: tile.9
= control target key start
LH: loop header
LB: loop body
LE: loop exit
PB: predicated region body
PF: predicated region fallthrough
CT: control target
= control target key end

     0   :  { %s10_s10 = smov 3  ;;  %vm12_vm0 = vcmask 523264   ;;  %s29_s11 = smov 64   ;;  %vm19_vm1 = vcmask 1048064   ;;  %s49_s0 = inlined_call_operand.vmem [shape: f32[2,2,64], index: 0, kind: input, shape index: {}]   ;;  %s50_s1 = inlined_call_operand.vmem [shape: f32[2,128], index: 1, kind: output, shape index: {}]  }
   0x1   :  { %v27_v0 = vld [vmem:[%s49_s0 + $0x2] sm:$0x3]  ;;  %v8_v1 = vld [vmem:[%s49_s0] sm:$0x3]  ;;  %s15_s0 = smov 3 }
   0x2   :  { %7 = vst [vmem:[#allocation1 + $0x8] sm:$0x3] %v27_v0  ;;  %9 = vst [vmem:[#allocation1] sm:$0x3] %v8_v1 }
   0x9   :  { %v16_v2 = vld [vmem:[#allocation1 + $0x1] ss:$8 sm:%s15_s0]   ;;  %v11_v3 = vld [vmem:[#allocation1] ss:$8 sm:%s10_s10]  }
   0xa   :  { %17 = vrot.lane.b32.xlu0 %v16_v2, %s29_s11  ;;  %13 = vst.msk [vmem:[#allocation0] sm:$0x3] %vm12_vm0, %v11_v3  }
  0x7c   :  { %v18_v4 = vpop.permute.xlu0 %17  }
  0x7d   :  { %20 = vst.msk [vmem:[#allocation0] sm:$0x3] %vm19_vm1, %v18_v4  }
  0x84   :  { %v24_v5 = vld [vmem:[#allocation0] sm:$0x3] }
  0x85   :  { %26 = vst [vmem:[%s50_s1] sm:$0x3] %v24_v5 }

// kernel: token_forward.1
= control target key start
LH: loop header
LB: loop body
LE: loop exit
PB: predicated region body
PF: predicated region fallthrough
CT: control target
= control target key end

     0   :  { %s312_s9 = smov 0   ;;  %s342_s0 = inlined_call_operand.vmem [shape: s32[256,2], index: 0, kind: input, shape index: {}]   ;;  %s343_s1 = inlined_call_operand.vmem [shape: f32[2,128], index: 1, kind: input, shape index: {}]   ;;  %s344_s2 = inlined_call_operand.vmem [shape: f32[256,128], index: 2, kind: output, shape index: {}]  }
   0x1 LB: > { %s260_s10 = sadd.s32 4294967295, %s293_s9   ;;  %p264_p0 = scmp.ge.s32.totalorder %s293_s9, 1  ;;  %s293_s9 = sphi %s312_s9, %s12_s9  }
   0x2   : > { %p113_p1 = scmp.lt.s32.totalorder %s293_s9, 9 }
   0x4   : > { %p114_p2 = pnand %p264_p0, %p113_p1 }
   0x5   : > { %s265_s11 = sshll.u32 (!%p114_p2), %s260_s10, 2  ;;  %v295_v0 = vmov (!%p114_p2), 1   ;;  %v296_v5 = vmov (!%p114_p2), 0   ;;  %v151_v6 = vlaneseq (!%p114_p2)  ;;  %v270_v12 = vld [vmem:[%s343_s1] ss:$0 sm:$0xff] (!%p114_p2) }
   0x6   : > { %117 = sbr.rel (%p114_p2) target bundleno = 162 (0xa2), region = 28  ;;  %284 = vset.pattern.permute.xlu1 (!%p114_p2), %v295_v0  ;;  %283 = vset.pattern.permute.xlu0 (!%p114_p2), %v295_v0  ;;  %p136_p3 = scmp.lt.s32.totalorder (!%p114_p2), %s265_s11, 31  ;;  %v269_v13 = vld [vmem:[%s343_s1 + $0x1] ss:$0 sm:$0xff] (!%p114_p2) }
   0x7   : > { %v152_v9 = vand.u32 (!%p114_p2), 127, %v151_v6 }
   0x9   : > { %vm153_vm0 = vcmp.ge.s32.totalorder (!%p114_p2), %v152_v9, 64 }
   0xd   : > { %s346_s11 = smov (!%p136_p3, %s265_s11), 31 }
   0xe   : > { %s266_s12 = sshll.u32 %s346_s11, 3 }
   0xf   : > { %s139_s15 = scalar_lea.vmem %s342_s0, %s266_s12  ;;  %s145_s22 = scalar_lea.vmem %s344_s2, %s266_s12 }
  0x10   : > { %v149_v1 = vld [vmem:[%s139_s15 + $0x10] sm:$0xff]  ;;  %v147_v2 = vld [vmem:[%s139_s15] sm:$0xff]  ;;  %v150_v3 = vld [vmem:[%s139_s15 + $0x18] sm:$0xff] }
  0x11   : > { %161 = vperm.xlu1 %284, %v149_v1   ;;  %155 = vperm.xlu0 %283, %v147_v2   ;;  %v148_v4 = vld [vmem:[%s139_s15 + $0x8] sm:$0xff] }
  0x15   : > { %164 = vperm.xlu1 %284, %v150_v3   ;;  %158 = vperm.xlu0 %283, %v148_v4  }
  0x19   : > { %286 = vset.pattern.permute.xlu1 %v296_v5  ;;  %285 = vset.pattern.permute.xlu0 %v296_v5 }
  0x1a   : > { %170 = vperm.xlu1 %286, %v148_v4   ;;  %167 = vperm.xlu0 %285, %v147_v2  }
  0x1e   : > { %173 = vperm.xlu1 %286, %v149_v1   ;;  %176 = vperm.xlu0 %285, %v150_v3  }
  0x90   : > { %v162_v7 = vpop.permute.xlu1 %161  ;;  %v156_v8 = vpop.permute.xlu0 %155 }
  0x94   : > { %v165_v10 = vpop.permute.xlu1 %164  ;;  %v159_v11 = vpop.permute.xlu0 %158 }
  0x99   : > { %v171_v14 = vpop.permute.xlu1 %170  ;;  %v168_v15 = vpop.permute.xlu0 %167 }
  0x9a   : > { %v179_v16 = vsel %vm153_vm0, %v159_v11, %v171_v14  ;;  %v178_v17 = vsel %vm153_vm0, %v156_v8, %v168_v15 }
  0x9b   : > { %vm184_vm1 = vcmp.eq.s32.totalorder %v179_v16, 1  ;;  %vm183_vm2 = vcmp.eq.s32.totalorder %v178_v17, 1 }
  0x9c   : > { %v197_v18 = vsel %vm184_vm1, %v269_v13, %v270_v12  ;;  %v196_v19 = vsel %vm183_vm2, %v269_v13, %v270_v12 }
  0x9d   : > { %201 = vst [vmem:[%s145_s22 + $0x8] sm:$0xff] %v197_v18  ;;  %200 = vst [vmem:[%s145_s22] sm:$0xff] %v196_v19  ;;  %v174_v20 = vpop.permute.xlu1 %173  ;;  %v177_v21 = vpop.permute.xlu0 %176 }
  0x9e   : > { %v180_v22 = vsel %vm153_vm0, %v162_v7, %v174_v20  ;;  %v181_v23 = vsel %vm153_vm0, %v165_v10, %v177_v21 }
  0x9f   : > { %vm185_vm3 = vcmp.eq.s32.totalorder %v180_v22, 1  ;;  %vm186_vm4 = vcmp.eq.s32.totalorder %v181_v23, 1 }
  0xa0   : > { %v198_v24 = vsel %vm185_vm3, %v269_v13, %v270_v12  ;;  %v199_v25 = vsel %vm186_vm4, %v269_v13, %v270_v12 }
  0xa1   : > { %202 = vst [vmem:[%s145_s22 + $0x10] sm:$0xff] %v198_v24  ;;  %203 = vst [vmem:[%s145_s22 + $0x18] sm:$0xff] %v199_v25 }
  0xa2 PF: > { %s12_s9 = sadd.s32 1, %s293_s9  }
  0xa3   : > { %p9_p4 = scmp.ge.s32.totalorder %s12_s9, 10  }
  0xa5   :  { %11 = sbr.rel (!%p9_p4) target bundleno = 1 (0x1), region = 58 }

</bundles_post_ra>
